<compile_context>
chip_gen: v7x
topology: tpu7x:2x2x1
jax: 0.10.0
libtpu: 0.0.40
codegen_flags: <defaults>
</compile_context>

<pallas_src>
import functools

import jax
import jax.numpy as jnp
from jax.experimental import pallas as pl
from jax.experimental.pallas import tpu as pltpu


def _sepconv_kernel(*refs, K, stride, pad, rh, TL, TLS, L, has_halo):
    """One (batch, L-tile) grid step of the fused separable conv.

    refs (has_halo=True):  x_chunk, halo_left, halo_right, w, b, out
    refs (has_halo=False): x_chunk, w, b, out

    x_chunk : (1, C_in, CW)     input chunk starting at true column j*TLS
    halo_*  : (1, C_in, 128)    128-col blocks ending at / starting after the chunk
    w       : (K, C_out, C_in)  fused (depthwise x pointwise) conv weight
    b       : (C_out, 1)        effective bias (pointwise + folded depthwise), f32
    out     : (1, C_out, TL)    output tile (length on lanes -> dense stores)
    """
    if has_halo:
        x_ref, hl_ref, hr_ref, w_ref, b_ref, o_ref = refs
    else:
        x_ref, w_ref, b_ref, o_ref = refs
        hl_ref = hr_ref = None

    j = pl.program_id(1)
    C_in = x_ref.shape[1]
    C_out = o_ref.shape[1]
    CW = x_ref.shape[2]

    # ---- assemble the zero-padded window (true cols j*TLS - pad ...) --------
    # The jnp.where masks implement the conv's "same" zero padding (and also
    # zero the garbage lanes of ragged edge blocks), replacing the wrapper-side
    # jnp.pad of the whole input.
    chunk = x_ref[0]                                               # (C_in, CW)
    col = jax.lax.broadcasted_iota(jnp.int32, (C_in, CW), 1) + j * TLS
    chunk = jnp.where(col < L, chunk, jnp.zeros_like(chunk))

    pieces = []
    if pad > 0:
        if has_halo:
            left = hl_ref[0, :, 128 - pad:]                        # (C_in, pad)
            lcol = (jax.lax.broadcasted_iota(jnp.int32, (C_in, pad), 1)
                    + j * TLS - pad)
            left = jnp.where((lcol >= 0) & (lcol < L), left,
                             jnp.zeros_like(left))
        else:
            left = jnp.zeros((C_in, pad), chunk.dtype)
        pieces.append(left)
    pieces.append(chunk)
    if has_halo and rh > 0:
        right = hr_ref[0, :, :rh]                                  # (C_in, rh)
        rcol = (jax.lax.broadcasted_iota(jnp.int32, (C_in, rh), 1)
                + (j + 1) * TLS)
        right = jnp.where(rcol < L, right, jnp.zeros_like(right))
        pieces.append(right)
    window = pieces[0] if len(pieces) == 1 else jnp.concatenate(pieces, axis=1)

    # ---- K shifted MXU dots, f32 accumulation (MRB accumulate on v7x) -------
    w = w_ref[...]                                                 # (K, C_out, C_in)
    span = (TL - 1) * stride + 1
    acc = jnp.zeros((C_out, TL), jnp.float32)
    for k in range(K):
        if stride == 1:
            tap = window[:, k:k + TL]                              # (C_in, TL)
        else:
            tap = window[:, k:k + span:stride]                     # strided slice
        acc = acc + jnp.dot(w[k], tap, preferred_element_type=jnp.float32)

    acc = acc + b_ref[...]                                         # (C_out,1) bcast
    o_ref[0] = acc.astype(o_ref.dtype)


def separable_conv1d(x, w_dw, b_dw, w_pw, b_pw, *, kernel_size, stride,
                     depth_multiplier, tile_len=4096):
    """x: (N, C_in, L) like PyTorch.  Returns (N, C_out, L_out)."""
    N, C_in, L = x.shape
    K = int(kernel_size)
    s = int(stride)
    dm = int(depth_multiplier)
    C_out = w_pw.shape[0]
    pad = K // 2
    rh = max(K - 1 - pad, 0)                      # right-halo columns needed
    L_out = (L + 2 * pad - K) // s + 1
    assert pad <= 128 and rh <= 128, "kernel_size too large for 128-wide halos"

    # ---- fuse depthwise into the pointwise weight (pointwise is linear) -----
    # Depthwise out channel j = c*dm + m reads input channel c (groups=C_in).
    wdw_g = w_dw[:, 0, :].reshape(C_in, dm, K).astype(jnp.float32)      # [c,m,k]
    wpw_f = w_pw[:, :, 0].astype(jnp.float32)                           # [o, c*dm+m]
    wpw_g = wpw_f.reshape(C_out, C_in, dm)                              # [o,c,m]
    w_fused = jnp.einsum("ocm,cmk->koc", wpw_g, wdw_g).astype(x.dtype)  # (K,C_out,C_in)
    b_eff = (b_pw.astype(jnp.float32)
             + wpw_f @ b_dw.astype(jnp.float32)).reshape(C_out, 1)      # f32

    # ---- L tiling ------------------------------------------------------------
    if L_out <= tile_len:
        TL, n_tiles = L_out, 1
    else:
        assert tile_len % 128 == 0
        TL = tile_len
        n_tiles = -(-L_out // TL)
    TLS = TL * s                                   # input cols consumed per tile
    multi = n_tiles > 1
    has_halo = multi and K > 1

    if multi:
        CW = TLS                                   # chunk width (multiple of 128)
    else:
        needed = max((TL - 1) * s + K - pad, 1)    # single ragged block covers reads
        CW = -(-needed // 128) * 128

    n128 = -(-L // 128)                            # number of 128-col blocks in L
    n_chunk_blocks = max(-(-L // CW), 1)
    tls_blocks = TLS // 128 if multi else 0

    kernel = functools.partial(_sepconv_kernel, K=K, stride=s, pad=pad, rh=rh,
                               TL=TL, TLS=TLS, L=L, has_halo=has_halo)

    # ---- specs ---------------------------------------------------------------
    chunk_spec = pl.BlockSpec(
        (1, C_in, CW),
        lambda b, j: (b, 0, jnp.minimum(j, n_chunk_blocks - 1)))
    in_specs = [chunk_spec]
    args = [x]
    if has_halo:
        # Tail of the previous chunk (left halo) and head of the next chunk
        # (right halo), 128 columns each; clamped indices are fully masked in
        # the kernel.  Extra HBM traffic is 2*128 cols per tile (~6% at TL=4096).
        in_specs.append(pl.BlockSpec(
            (1, C_in, 128),
            lambda b, j: (b, 0, jnp.minimum(
                jnp.maximum(j * tls_blocks - 1, 0), n128 - 1))))
        in_specs.append(pl.BlockSpec(
            (1, C_in, 128),
            lambda b, j: (b, 0, jnp.minimum((j + 1) * tls_blocks, n128 - 1))))
        args += [x, x]
    in_specs.append(pl.BlockSpec((K, C_out, C_in), lambda b, j: (0, 0, 0)))
    in_specs.append(pl.BlockSpec((C_out, 1), lambda b, j: (0, 0)))
    args += [w_fused, b_eff]

    # ---- generation-aware VMEM budget ----------------------------------------
    def _ru(a, b):
        return -(-a // b) * b
    itemsize = jnp.dtype(x.dtype).itemsize
    cin_s, cout_s = _ru(C_in, 8), _ru(C_out, 8)
    est = (2 * cin_s * CW * itemsize                              # chunk (x2 buf)
           + (4 * cin_s * 128 * itemsize if has_halo else 0)      # halos (x2 buf)
           + 2 * cout_s * _ru(TL, 128) * itemsize                 # out   (x2 buf)
           + 6 * cin_s * _ru(CW + K, 128) * max(itemsize, 4)      # window/taps
           + 2 * cout_s * _ru(TL, 128) * 4                        # f32 accumulator
           + (K + 1) * cout_s * 128 * 4)                          # weights + bias
    try:
        cap = int(getattr(pltpu.get_tpu_info(), "vmem_capacity_bytes",
                          64 * 1024 * 1024))
    except Exception:
        cap = 64 * 1024 * 1024                                    # v7x floor
    vmem_limit = int(min(max(4 * est, 16 * 1024 * 1024), int(0.45 * cap)))

    # ---- cost hint for XLA scheduling (memory-bound custom call) -------------
    flops = 2 * N * L_out * C_out * C_in * K + 2 * N * L_out * C_out
    bytes_accessed = int(x.size * itemsize + N * C_out * L_out * itemsize
                         + w_fused.size * itemsize + b_eff.size * 4)
    cost = pl.CostEstimate(flops=flops, transcendentals=0,
                           bytes_accessed=bytes_accessed)

    out = pl.pallas_call(
        kernel,
        out_shape=jax.ShapeDtypeStruct((N, C_out, L_out), x.dtype),
        grid_spec=pltpu.PrefetchScalarGridSpec(
            num_scalar_prefetch=0,
            grid=(N, n_tiles),
            in_specs=in_specs,
            out_specs=pl.BlockSpec((1, C_out, TL), lambda b, j: (b, 0, j)),
        ),
        compiler_params=pltpu.CompilerParams(
            dimension_semantics=("parallel", "parallel"),
            vmem_limit_bytes=vmem_limit),
        cost_estimate=cost,
    )(*args)

    return out                                      # (N, C_out, L_out), NCL


def _reference(x, w_dw, b_dw, w_pw, b_pw, *, stride, pad):
    """Pure-JAX reference matching the PyTorch module."""
    dn = ("NCH", "OIH", "NCH")
    y = jax.lax.conv_general_dilated(
        x, w_dw, (stride,), [(pad, pad)], dimension_numbers=dn,
        feature_group_count=x.shape[1])
    y = y + b_dw[None, :, None]
    z = jax.lax.conv_general_dilated(
        y, w_pw, (1,), [(0, 0)], dimension_numbers=dn)
    z = z + b_pw[None, :, None]
    return z


if __name__ == "__main__":
    # Module hyperparameters (small, consistent with the PyTorch __init__).
    in_channels = 4
    out_channels = 8
    kernel_size = 3
    stride = 1
    depth_multiplier = 2
    pad = kernel_size // 2

    Cm = in_channels * depth_multiplier
    key = jax.random.PRNGKey(0)
    kx, k1, k2, k3, k4, kx2 = jax.random.split(key, 6)

    # Deterministic synthetic parameters (same shapes as the nn.Conv1d weights).
    w_dw = 0.1 * jax.random.normal(k1, (Cm, 1, kernel_size), dtype=jnp.float32)
    b_dw = 0.1 * jax.random.normal(k2, (Cm,), dtype=jnp.float32)
    w_pw = 0.1 * jax.random.normal(k3, (out_channels, Cm, 1), dtype=jnp.float32)
    b_pw = 0.1 * jax.random.normal(k4, (out_channels,), dtype=jnp.float32)

    # Small shape consistent with the module: (batch=2, channels=4, length=16).
    N, L = 2, 16
    x = jax.random.normal(kx, (N, in_channels, L), dtype=jnp.float32)
    out = jax.block_until_ready(separable_conv1d(
        x, w_dw, b_dw, w_pw, b_pw, kernel_size=kernel_size, stride=stride,
        depth_multiplier=depth_multiplier))
    ref = _reference(x, w_dw, b_dw, w_pw, b_pw, stride=stride, pad=pad)
    assert out.shape == ref.shape, (out.shape, ref.shape)
    assert jnp.allclose(out, ref, atol=1e-4, rtol=1e-4), float(
        jnp.max(jnp.abs(out - ref)))

    # Additional check exercising the windowed (halo'd, ragged-edge) multi-tile
    # path with a small tile length.
    N2, L2 = 2, 1000
    x2 = jax.random.normal(kx2, (N2, in_channels, L2), dtype=jnp.float32)
    out2 = jax.block_until_ready(separable_conv1d(
        x2, w_dw, b_dw, w_pw, b_pw, kernel_size=kernel_size, stride=stride,
        depth_multiplier=depth_multiplier, tile_len=256))
    ref2 = _reference(x2, w_dw, b_dw, w_pw, b_pw, stride=stride, pad=pad)
    assert out2.shape == ref2.shape, (out2.shape, ref2.shape)
    assert jnp.allclose(out2, ref2, atol=1e-4, rtol=1e-4), float(
        jnp.max(jnp.abs(out2 - ref2)))

    print("KERNEL_OK")
</pallas_src>

<mosaic_0001>
module attributes {stable_mosaic.version = 11 : i64} {
  func.func @_sepconv_kernel(%arg0: i32, %arg1: i32, %arg2: memref<1x4x128xf32, #tpu.memory_space<vmem>>, %arg3: memref<3x8x4xf32, #tpu.memory_space<vmem>>, %arg4: memref<8x1xf32, #tpu.memory_space<vmem>>, %arg5: memref<1x8x16xf32, #tpu.memory_space<vmem>>) attributes {dimension_semantics = [#tpu.dimension_semantics<parallel>, #tpu.dimension_semantics<parallel>], iteration_bounds = array<i64: 2, 1>, scalar_prefetch = 0 : i64, scratch_operands = 0 : i64, tpu.core_type = #tpu.core_type<tc>, window_params = [{transform_indices = @transform_0, window_bounds = array<i64: 1, 4, 128>}, {pipeline_mode = #tpu.pipeline_mode<synchronous>, transform_indices = @transform_1, window_bounds = array<i64: 3, 8, 4>}, {pipeline_mode = #tpu.pipeline_mode<synchronous>, transform_indices = @transform_2, window_bounds = array<i64: 8, 1>}, {transform_indices = @transform_3, window_bounds = array<i64: 1, 8, 16>}]} {
    %c0 = arith.constant 0 : index
    %c0_0 = arith.constant 0 : index
    %c0_1 = arith.constant 0 : index
    %0 = vector.load %arg2[%c0, %c0_0, %c0_1] : memref<1x4x128xf32, #tpu.memory_space<vmem>>, vector<1x4x128xf32>
    %1 = vector.shape_cast %0 : vector<1x4x128xf32> to vector<4x128xf32>
    %2 = tpu.iota {dimensions = array<i32: 1>} : vector<4x128xi32>
    %c16_i32 = arith.constant 16 : i32
    %3 = arith.muli %arg1, %c16_i32 : i32
    %4 = vector.broadcast %3 : i32 to vector<4x128xi32>
    %5 = arith.addi %2, %4 : vector<4x128xi32>
    %c16_i32_2 = arith.constant 16 : i32
    %6 = vector.broadcast %c16_i32_2 : i32 to vector<4x128xi32>
    %7 = arith.cmpi slt, %5, %6 : vector<4x128xi32>
    %cst = arith.constant 0.000000e+00 : f32
    %8 = vector.broadcast %cst : f32 to vector<4x128xf32>
    %9 = arith.select %7, %1, %8 : vector<4x128xi1>, vector<4x128xf32>
    %cst_3 = arith.constant 0.000000e+00 : f32
    %10 = vector.broadcast %cst_3 : f32 to vector<4x1xf32>
    %11 = tpu.concatenate %10, %9 in 1 : vector<4x1xf32>, vector<4x128xf32> -> vector<4x129xf32>
    %c0_4 = arith.constant 0 : index
    %c0_5 = arith.constant 0 : index
    %c0_6 = arith.constant 0 : index
    %12 = vector.load %arg3[%c0_4, %c0_5, %c0_6] : memref<3x8x4xf32, #tpu.memory_space<vmem>>, vector<3x8x4xf32>
    %cst_7 = arith.constant 0.000000e+00 : f32
    %13 = vector.broadcast %cst_7 : f32 to vector<8x16xf32>
    %14 = vector.extract_strided_slice %11 {offsets = [0, 0], sizes = [4, 16], strides = [1, 1]} : vector<4x129xf32> to vector<4x16xf32>
    %15 = vector.extract_strided_slice %12 {offsets = [0, 0, 0], sizes = [1, 8, 4], strides = [1, 1, 1]} : vector<3x8x4xf32> to vector<1x8x4xf32>
    %16 = vector.shape_cast %15 : vector<1x8x4xf32> to vector<8x4xf32>
    %cst_8 = arith.constant dense<0.000000e+00> : vector<8x16xf32>
    %17 = tpu.matmul %16, %14, %cst_8 {dimension_numbers = #tpu.dot_dimension_numbers<[1], [0], [0], [1], [0, 0, 1, 1], [], []>} : vector<8x4xf32>, vector<4x16xf32>, vector<8x16xf32> -> vector<8x16xf32>
    %18 = arith.addf %13, %17 : vector<8x16xf32>
    %19 = vector.extract_strided_slice %11 {offsets = [0, 1], sizes = [4, 16], strides = [1, 1]} : vector<4x129xf32> to vector<4x16xf32>
    %20 = vector.extract_strided_slice %12 {offsets = [1, 0, 0], sizes = [1, 8, 4], strides = [1, 1, 1]} : vector<3x8x4xf32> to vector<1x8x4xf32>
    %21 = vector.shape_cast %20 : vector<1x8x4xf32> to vector<8x4xf32>
    %cst_9 = arith.constant dense<0.000000e+00> : vector<8x16xf32>
    %22 = tpu.matmul %21, %19, %cst_9 {dimension_numbers = #tpu.dot_dimension_numbers<[1], [0], [0], [1], [0, 0, 1, 1], [], []>} : vector<8x4xf32>, vector<4x16xf32>, vector<8x16xf32> -> vector<8x16xf32>
    %23 = arith.addf %18, %22 : vector<8x16xf32>
    %24 = vector.extract_strided_slice %11 {offsets = [0, 2], sizes = [4, 16], strides = [1, 1]} : vector<4x129xf32> to vector<4x16xf32>
    %25 = vector.extract_strided_slice %12 {offsets = [2, 0, 0], sizes = [1, 8, 4], strides = [1, 1, 1]} : vector<3x8x4xf32> to vector<1x8x4xf32>
    %26 = vector.shape_cast %25 : vector<1x8x4xf32> to vector<8x4xf32>
    %cst_10 = arith.constant dense<0.000000e+00> : vector<8x16xf32>
    %27 = tpu.matmul %26, %24, %cst_10 {dimension_numbers = #tpu.dot_dimension_numbers<[1], [0], [0], [1], [0, 0, 1, 1], [], []>} : vector<8x4xf32>, vector<4x16xf32>, vector<8x16xf32> -> vector<8x16xf32>
    %28 = arith.addf %23, %27 : vector<8x16xf32>
    %c0_11 = arith.constant 0 : index
    %c0_12 = arith.constant 0 : index
    %29 = vector.load %arg4[%c0_11, %c0_12] : memref<8x1xf32, #tpu.memory_space<vmem>>, vector<8x1xf32>
    %30 = vector.broadcast %29 : vector<8x1xf32> to vector<8x16xf32>
    %31 = arith.addf %28, %30 : vector<8x16xf32>
    %c0_13 = arith.constant 0 : index
    %c0_14 = arith.constant 0 : index
    %c0_15 = arith.constant 0 : index
    %32 = vector.load %arg5[%c0_13, %c0_14, %c0_15] : memref<1x8x16xf32, #tpu.memory_space<vmem>>, vector<1x8x16xf32>
    %33 = vector.shape_cast %32 : vector<1x8x16xf32> to vector<8x16xf32>
    %34 = vector.shape_cast %31 : vector<8x16xf32> to vector<1x8x16xf32>
    tpu.vector_store %arg5[%c0_13, %c0_14, %c0_15], %34 {strides = array<i32>} : memref<1x8x16xf32, #tpu.memory_space<vmem>>, vector<1x8x16xf32>,
    return
  }
  func.func @transform_0(%arg0: i32, %arg1: i32) -> (i32, i32, i32) {
    %c0_i32 = arith.constant 0 : i32
    %0 = arith.minsi %arg1, %c0_i32 : i32
    %c0_i32_0 = arith.constant 0 : i32
    %c0_i32_1 = arith.constant 0 : i32
    return %arg0, %c0_i32_0, %0 : i32, i32, i32
  }
  func.func @transform_1(%arg0: i32, %arg1: i32) -> (i32, i32, i32) {
    %c0_i32 = arith.constant 0 : i32
    %c0_i32_0 = arith.constant 0 : i32
    %c0_i32_1 = arith.constant 0 : i32
    %c0_i32_2 = arith.constant 0 : i32
    return %c0_i32, %c0_i32_0, %c0_i32_1 : i32, i32, i32
  }
  func.func @transform_2(%arg0: i32, %arg1: i32) -> (i32, i32) {
    %c0_i32 = arith.constant 0 : i32
    %c0_i32_0 = arith.constant 0 : i32
    %c0_i32_1 = arith.constant 0 : i32
    return %c0_i32, %c0_i32_0 : i32, i32
  }
  func.func @transform_3(%arg0: i32, %arg1: i32) -> (i32, i32, i32) {
    %c0_i32 = arith.constant 0 : i32
    %c0_i32_0 = arith.constant 0 : i32
    return %arg0, %c0_i32, %arg1 : i32, i32, i32
  }
}

</mosaic_0001>

<bundles_post_ra>
// kernel: tpu_custom_call.1
= control target key start
LH: loop header
LB: loop body
LE: loop exit
PB: predicated region body
PF: predicated region fallthrough
CT: control target
= control target key end

     0   :  { %8 = vsyncpa [#allocation3], 0  ;;  %s891_s0 = inlined_call_operand.vmem [shape: f32[2,4,16], index: 0, kind: input, shape index: {}]   ;;  %s892_s1 = inlined_call_operand.vmem [shape: f32[3,8,4], index: 1, kind: input, shape index: {}]   ;;  %s893_s2 = inlined_call_operand.vmem [shape: f32[8,1], index: 2, kind: input, shape index: {}]   ;;  %s894_s3 = inlined_call_operand.hbm [shape: f32[2,8,16], index: 3, kind: output, shape index: {}]  }
   0x1   :  { %10 = vsyncpa [#allocation3 + $0x1], 0  ;;  %s758_s12 = smov 0   ;;  %s760_s13 = smov 0  }
   0x2   :  { %s762_s14 = smov 0   ;;  %s764_s15 = smov 0  }
   0x3   :  { %s766_s16 = smov 0   ;;  %s768_s17 = smov 0  }
   0x4 LB: > { %s550_s18 = sadd.s32 4294967295, %s729_s17   ;;  %s551_s19 = sadd.s32 4294967294, %s729_s17   ;;  %s729_s17 = sphi %s768_s17, %s16_s17   ;;  %s725_s16 = sphi %s766_s16, %s901_s16   ;;  %s721_s15 = sphi %s764_s15, %s900_s15   ;;  %s717_s14 = sphi %s762_s14, %s899_s14   ;;  %s713_s13 = sphi %s760_s13, %s898_s13   ;;  %s709_s12 = sphi %s758_s12, %s897_s12  }
   0x5   : > { %s28_s20 = sadd.s32 1, %s725_s16  ;;  %s111_s21 = sadd.s32 1, %s717_s14 }
   0x6   : > { %p30_p0 = scmp.ge.s32.totalorder %s28_s20, 2  ;;  %p121_p1 = scmp.ne.s32.totalorder %s717_s14, %s713_s13 }
   0x7   : > { %p122_p2 = scmp.eq.s32.totalorder %s550_s18, 1  ;;  %p127_p3 = scmp.ne.s32.totalorder %s713_s13, %s709_s12 }
   0x8   : > { %s903_s20 = smov (%p30_p0, %s28_s20), 0  ;;  %p128_p5 = scmp.eq.s32.totalorder %s551_s19, 1 }
   0x9   : > { %p798_p4 = por %p122_p2, %p121_p1  ;;  %s106_s23 = ssub.s32 %s725_s16, %s903_s20 }
   0xa   : > { %p554_p6 = scmp.ge.s32.totalorder %s729_s17, 1  ;;  %p109_p7 = scmp.eq.s32.totalorder %s106_s23, 0 }
   0xb   : > { %p805_p8 = por %p128_p5, %p127_p3  ;;  %p166_p9 = scmp.lt.s32.totalorder %s729_s17, 3 }
   0xc   : > { %s811_s25 = scalar_select %p109_p7, %s717_s14, %s111_s21  }
   0xd   : > { %p167_p10 = pnand %p554_p6, %p166_p9 }
   0xe   : > { %p196_p11 = scmp.lt.s32.totalorder (!%p167_p10), %s721_s15, 1  ;;  %v206_v0 = vlaneseq (!%p167_p10)  ;;  %v731_v1 = vmov (!%p167_p10), 0.0   ;;  %s732_s4 = smov (!%p167_p10), 1   ;;  %vm733_vm1 = vmmov (!%p167_p10), 0   ;;  %v734_v5 = vmov (!%p167_p10), 0   ;;  %v219_v8 = vld [vmem:[%s892_s1] sm:$0xff] (!%p167_p10) }
   0xf   : > { %170 = sbr.rel (%p167_p10) target bundleno = 494 (0x1ee), region = 32  ;;  %578 = vmatprep.subr.mxu1 (!%p167_p10), %v731_v1  ;;  %573 = vmatprep.subr.mxu0 (!%p167_p10), %v731_v1  ;;  %vm217_vm2 = vcmask (!%p167_p10), 7168   ;;  %vm229_vm3 = vcmask (!%p167_p10), 1043456   ;;  %vm225_vm4 = vcmask (!%p167_p10), 31744   ;;  %s735_s7 = smov (!%p167_p10), 126   ;;  %v455_v9 = vld [vmem:[%s893_s2] sm:$0xff] (!%p167_p10) }
  0x10   : > { %v207_v2 = vand.u32 (!%p167_p10), 127, %v206_v0  ;;  %575 = vmatprep.mubr.msk.f32.mxu0 (!%p167_p10), %vm733_vm1, %v731_v1  ;;  %580 = vmatprep.mubr.msk.f32.mxu1 (!%p167_p10), %vm733_vm1, %v731_v1  ;;  %s736_s8 = smov (!%p167_p10), 127   ;;  %v220_v10 = vld [vmem:[%s892_s1 + $0x8] sm:$0xff] (!%p167_p10)  ;;  %v221_v13 = vld [vmem:[%s892_s1 + $0x10] sm:$0xff] (!%p167_p10)  ;;  %s191_s23 = sand.u32 (!%p167_p10), 1, %s713_s13   ;;  %vm462_vm5 = vcmask (!%p167_p10), 130048  }
  0x11   : > { %649 = vset.pattern.permute.xlu1 (!%p167_p10), %v734_v5  ;;  %650 = vset.pattern.permute.xlu0 (!%p167_p10), %v734_v5  ;;  %s465_s6 = scalar_lea.sflag (!%p167_p10), [#allocation3], %s191_s23 }
  0x12   : > { %vm211_vm0 = vcmp.lt.s32.totalorder (!%p167_p10), %v207_v2, 16 }
  0x16   : > { %s197_s26 = scalar_select %p196_p11, %s721_s15, 1 }
  0x18   : > { %s556_s27 = sshll.u32 %s197_s26, 2  ;;  %s555_s26 = sshll.u32 %s191_s23, 3 }
  0x19   : > { %s202_s30 = scalar_lea.vmem %s891_s0, %s556_s27  ;;  %s564_s27 = sshll.u32 %s721_s15, 7 }
  0x1a   : > { %v205_v3 = vld [vmem:[%s202_s30] sm:$0xf]  ;;  %s193_s28 = scalar_lea.vmem [#allocation2], %s555_s26  ;;  %s844_s5 = scalar_lea.hbm %s894_s3, %s564_s27 }
  0x1b   : > { %v212_v4 = vsel %vm211_vm0, %v205_v3, 0.0  ;;  %s479_s29 = sshll.u32 %s193_s28, 4  ;;  %s737_s15 = smov [#allocation2]   ;;  %s846_s29 = int_to_ptr.vmem [resolvable:$true] %s479_s29 }
  0x1c   : > { %214 = vrot.lane.b32.xlu0 %v212_v4, %s732_s4 }
  0x8e   : > { %v215_v6 = vpop.permute.xlu0 %214 }
  0x8f   : > { %v218_v7 = vsel %vm217_vm2, 0.0, %v215_v6 }
  0x90   : > { %377 = vrot.lane.b32.xlu1 %v218_v7, %s735_s7  ;;  %223 = vrot.lane.b32.xlu0 %v218_v7, %s736_s8  ;;  %s651_s7 = scalar_lea.vmem %s846_s29, 128  ;;  %s655_s8 = sshll.u32 %s737_s15, 4  ;;  %s656_s8 = int_to_ptr.vmem [resolvable:$false] %s655_s8 }
  0x91   : > { %579 = vmatpush3.msk.msra.mxu1 %vm229_vm3, %v218_v7  ;;  %p652_p12 = scmp.ne.s32.totalorder %s846_s29, %s651_s7  ;;  %s657_s9 = scalar_lea.vmem %s656_s8, 256 }
  0x92   : > { %581 = vmatmul.mubr.msk.f32.vlgmr.msra.gmra.mrb[0].mxu1 %vm225_vm4, %v219_v8  ;;  %p658_p1 = scmp.lt.s32.totalorder %s846_s29, %s656_s8  ;;  %p659_p2 = scmp.lt.s32.totalorder %s657_s9, %s651_s7 }
  0x93   : > { %p653_p13 = pnand %p652_p12, %p798_p4 }
  0x94   : > { %458 = vperm.xlu1 %649, %v455_v9   ;;  %p660_p3 = por %p659_p2, %p658_p1 }
  0x95   : > { %p654_p0 = pneg %p653_p13 }
  0x97   : > { %p661_p5 = pnand %p660_p3, %p654_p0 }
 0x102   : > { %v224_v11 = vpop.permute.xlu0 %223  ;;  %v378_v12 = vpop.permute.xlu1 %377 }
 0x103   : > { %574 = vmatpush3.msk.msra.mxu0 %vm229_vm3, %v224_v11 }
 0x104   : > { %576 = vmatmul.mubr.msk.f32.vlgmr.msra.gmra.mrb[0].mxu0 %vm225_vm4, %v220_v10  ;;  %583 = vmatprep.subr.mxu0 %v731_v1 }
 0x105   : > { %584 = vmatpush3.msk.msra.mxu0 %vm229_vm3, %v378_v12  ;;  %585 = vmatprep.mubr.msk.f32.mxu0 %vm733_vm1, %v731_v1 }
 0x108   : > { %586 = vmatmul.mubr.msk.f32.vlgmr.msra.gmra.mrb[2].mxu0 %vm225_vm4, %v221_v13 }
 0x113   : > { %v459_v20 = vpop.permute.xlu1 %458 }
 0x165   : > { %v373_v14 = vpop.f32.mrb[0].mxu1 }
 0x166   : > { %v582_v15 = vpop.f32.mrb[1].mxu1 }
 0x1d7   : > { %v298_v16 = vpop.f32.mrb[0].mxu0 }
 0x1d8   : > { %v577_v17 = vpop.f32.mrb[1].mxu0  ;;  %v374_v18 = vadd.f32 %v373_v14, %v298_v16 }
 0x1db   : > { %v450_v19 = vpop.f32.mrb[2].mxu0 }
 0x1dc   : > { %v454_v21 = vadd.f32 %v450_v19, %v374_v18  ;;  %v587_v22 = vpop.f32.mrb[3].mxu0 }
 0x1de   : > { %v461_v23 = vadd.f32 %v459_v20, %v454_v21 }
 0x1e0   : > { %463 = vst.msk [vmem:[%s193_s28] sm:$0xff] %vm462_vm5, %v461_v23 }
 0x1e1   : > { %664 = shalt.err (!%p661_p5)
}
 0x1e2   : > { %s665_s10 = scalar_lea.hbm %s844_s5, 128  ;;  %s669_s19 = scalar_lea.hbm %s894_s3, 256 }
 0x1e3   : > { %p666_p6 = scmp.ne.s32.totalorder %s844_s5, %s665_s10  ;;  %p670_p10 = scmp.lt.u32.totalorder %s844_s5, %s894_s3 }
 0x1e4   : > { %p671_p11 = scmp.lt.u32.totalorder %s669_s19, %s665_s10  ;;  %p673_p13 = scmp.lt.u32.totalorder %s665_s10, %s844_s5 }
 0x1e5   : > { %p667_p7 = pnand %p666_p6, %p798_p4 }
 0x1e6   : > { %p672_p12 = por %p671_p11, %p670_p10 }
 0x1e7   : > { %p668_p9 = pneg %p667_p7 }
 0x1e8   : > { %p674_p0 = por %p673_p13, %p672_p12 }
 0x1ea   : > { %p675_p1 = pnand %p674_p0, %p668_p9 }
 0x1ec   : > { %678 = shalt.err (!%p675_p1)
}
 0x1ed   : > { %588 = dma.vmem_to_hbm [thread:$0]  (%p798_p4), %s846_s29, 128, %s844_s5, %s465_s6  }
 0x1ee PF: > { %p594_p2 = scmp.ge.s32.totalorder %s729_s17, 2  ;;  %s491_s26 = sand.u32 1, %s709_s12  }
 0x1ef   : > { %s492_s27 = scalar_lea.sflag [#allocation3], %s491_s26 }
 0x1f0   : > { %p591_p3 = pnand %p594_p2, %p805_p8 }
 0x1f2   : > { %704 = dma.done.wait (!%p591_p3), %s492_s27, 128  }
 0x1f3   : > { %706 = vsyncadd (!%p591_p3), %s492_s27, 4294967168  ;;  %s16_s17 = sadd.s32 1, %s729_s17   ;;  %s897_s12 = smov %s713_s13 }
 0x1f4   : > { %p13_p5 = scmp.ge.s32.totalorder %s16_s17, 4   ;;  %s898_s13 = smov %s717_s14 }
 0x1f5   : > { %s899_s14 = smov %s811_s25  ;;  %s900_s15 = smov %s725_s16 }
 0x1f6   : > { %s901_s16 = smov %s903_s20  ;;  %15 = sbr.rel (!%p13_p5) target bundleno = 4 (0x4), region = 67 }
 0x1fd   :  { %497 = vsyncpa [#allocation3], 1 }
 0x1fe   :  { %499 = vsyncpa [#allocation3 + $0x1], 1 }

</bundles_post_ra>
